<compile_context>
chip_gen: v5e
topology: v5e:2x2
jax: 0.10.0
libtpu: 0.0.40
codegen_flags: <defaults>
</compile_context>

<pallas_src>
import jax
import jax.numpy as jnp
import numpy as np
from jax.experimental import pallas as pl
from jax.experimental.pallas import tpu as pltpu


def fused_lstm_kernel(x_ref, state_ref, w_ref, b_ref, out_ref):
    """All LSTM layers of one timestep, fused.

    x_ref:     (B, P)          layer-0 input, zero-padded to P = max(I, H)
    state_ref: (B, L*2*H)      packed prev state, per layer [h_l | c_l]
    w_ref:     (L, P+H, 4*H)   combined [W_ih ; W_hh] (pre-transposed) per layer
    b_ref:     (L, 1, 4*H)     fused bias (b_ih + b_hh) per layer
    out_ref:   (B, L*2*H)      packed new state (same layout as state_ref)
    """
    L = w_ref.shape[0]
    H = out_ref.shape[-1] // (2 * L)
    P = w_ref.shape[1] - H
    B = x_ref.shape[0]

    layer_in = x_ref[...]                                   # (B, P)
    out_chunks = []
    for l in range(L):                                      # static, unrolled
        h_prev = state_ref[:, l * 2 * H: l * 2 * H + H]     # (B, H)
        c_prev = state_ref[:, l * 2 * H + H: (l + 1) * 2 * H]

        # Single fused MXU pass over K = P + H (instead of two small matmuls).
        xh = jnp.concatenate([layer_in, h_prev], axis=-1)   # (B, P+H)
        gates = (jnp.dot(xh, w_ref[l], preferred_element_type=jnp.float32)
                 + b_ref[l])                                # (B, 4H)

        # Nonlinearity once on the full 4H-wide vreg (EUP), slice afterwards.
        sg = jax.nn.sigmoid(gates)
        tg = jnp.tanh(gates)
        i = sg[:, 0 * H:1 * H]
        f = sg[:, 1 * H:2 * H]
        g = tg[:, 2 * H:3 * H]
        o = sg[:, 3 * H:4 * H]

        c_new = f * c_prev + i * g
        h_new = o * jnp.tanh(c_new)
        out_chunks.append(h_new)
        out_chunks.append(c_new)

        # Next layer's input (zero-pad to P lanes; no-op when I == H).
        if H < P:
            layer_in = jnp.concatenate(
                [h_new, jnp.zeros((B, P - H), h_new.dtype)], axis=-1)
        else:
            layer_in = h_new

    # One lane-dense (B, L*2*H) store instead of 2*L masked 32-lane stores.
    out_ref[...] = jnp.concatenate(out_chunks, axis=-1)


@jax.jit
def lstm_controller_forward(x, h_prev, c_prev, w_stacked, b_stacked):
    """x: (B, I); h_prev/c_prev: (L, B, H); w_stacked: (L, P+H, 4H); b: (L,1,4H)."""
    B, I = x.shape
    L, _, H = h_prev.shape
    P = w_stacked.shape[1] - H

    if I < P:  # pad layer-0 input to the shared padded width P
        x = jnp.concatenate([x, jnp.zeros((B, P - I), x.dtype)], axis=-1)

    # Pack prev state lane-dense: (B, L*2*H), layout [h_0|c_0|h_1|c_1|...].
    state = jnp.concatenate([h_prev, c_prev], axis=-1)          # (L, B, 2H)
    state = jnp.transpose(state, (1, 0, 2)).reshape(B, L * 2 * H)

    new_state = pl.pallas_call(
        fused_lstm_kernel,
        in_specs=[pl.BlockSpec(memory_space=pltpu.MemorySpace.VMEM)] * 4,
        out_specs=pl.BlockSpec(memory_space=pltpu.MemorySpace.VMEM),
        out_shape=jax.ShapeDtypeStruct((B, L * 2 * H), jnp.float32),
        input_output_aliases={1: 0},   # new packed state overwrites old one
    )(x, state, w_stacked, b_stacked)

    ns = new_state.reshape(B, L, 2, H)
    h_new = jnp.transpose(ns[:, :, 0, :], (1, 0, 2))            # (L, B, H)
    c_new = jnp.transpose(ns[:, :, 1, :], (1, 0, 2))            # (L, B, H)
    outp = h_new[-1]                                            # (B, H)
    return outp, (h_new, c_new)


class LSTMControllerPallas:
    """Pallas equivalent of LSTMController (multi-layer LSTM, seq_len == 1)."""

    def __init__(self, num_inputs, num_outputs, num_layers, key, stdv=0.1):
        self.num_inputs = num_inputs
        self.num_outputs = num_outputs
        self.num_layers = num_layers
        H = num_outputs
        P = max(num_inputs, H)

        self.raw_params = []   # for the pure-JAX reference
        w_stack, b_stack = [], []
        for layer in range(num_layers):
            in_sz = num_inputs if layer == 0 else H
            key, k1, k2, k3, k4 = jax.random.split(key, 5)
            # PyTorch nn.LSTM params: weight_ih (4H, in), weight_hh (4H, H),
            # bias_ih (4H,), bias_hh (4H,), all Normal(0, stdv) after reset.
            w_ih = stdv * jax.random.normal(k1, (4 * H, in_sz), jnp.float32)
            w_hh = stdv * jax.random.normal(k2, (4 * H, H), jnp.float32)
            b_ih = stdv * jax.random.normal(k3, (4 * H,), jnp.float32)
            b_hh = stdv * jax.random.normal(k4, (4 * H,), jnp.float32)
            self.raw_params.append((w_ih, w_hh, b_ih, b_hh))

            # Combined pre-transposed weight: rows [0:in_sz] = W_ih.T,
            # rows [in_sz:P] = 0 (padding), rows [P:P+H] = W_hh.T.
            w_comb = jnp.zeros((P + H, 4 * H), jnp.float32)
            w_comb = w_comb.at[:in_sz, :].set(w_ih.T)
            w_comb = w_comb.at[P:P + H, :].set(w_hh.T)
            w_stack.append(w_comb)
            b_stack.append((b_ih + b_hh)[None, :])

        self.w_stacked = jnp.stack(w_stack, axis=0)   # (L, P+H, 4H)
        self.b_stacked = jnp.stack(b_stack, axis=0)   # (L, 1, 4H)

    def forward(self, x, prev_state):
        """x: (B, num_inputs); prev_state: (h, c) each (num_layers, B, H)."""
        h_prev, c_prev = prev_state
        return lstm_controller_forward(x, h_prev, c_prev,
                                       self.w_stacked, self.b_stacked)

    def forward_ref(self, x, prev_state):
        """Pure-JAX reference (same math, no Pallas) for correctness check."""
        h_prev, c_prev = prev_state
        H = self.num_outputs
        hs, cs = [], []
        layer_in = x
        for layer, (w_ih, w_hh, b_ih, b_hh) in enumerate(self.raw_params):
            gates = layer_in @ w_ih.T + h_prev[layer] @ w_hh.T + b_ih + b_hh
            i = jax.nn.sigmoid(gates[:, 0 * H:1 * H])
            f = jax.nn.sigmoid(gates[:, 1 * H:2 * H])
            g = jnp.tanh(gates[:, 2 * H:3 * H])
            o = jax.nn.sigmoid(gates[:, 3 * H:4 * H])
            c_new = f * c_prev[layer] + i * g
            h_new = o * jnp.tanh(c_new)
            hs.append(h_new)
            cs.append(c_new)
            layer_in = h_new
        return layer_in, (jnp.stack(hs, axis=0), jnp.stack(cs, axis=0))


if __name__ == "__main__":
    num_inputs = 32
    num_outputs = 32   # hidden size
    num_layers = 2
    batch = 2

    key = jax.random.PRNGKey(0)
    key, k_params, k_x, k_h, k_c = jax.random.split(key, 5)

    ctrl = LSTMControllerPallas(num_inputs, num_outputs, num_layers, k_params)

    x = jax.random.normal(k_x, (batch, num_inputs), jnp.float32)
    h0 = 0.05 * jax.random.normal(k_h, (num_layers, batch, num_outputs), jnp.float32)
    c0 = 0.05 * jax.random.normal(k_c, (num_layers, batch, num_outputs), jnp.float32)

    outp, (h1, c1) = ctrl.forward(x, (h0, c0))
    jax.block_until_ready((outp, h1, c1))

    # Sanity check against the pure-JAX reference.
    outp_ref, (h1_ref, c1_ref) = ctrl.forward_ref(x, (h0, c0))
    np.testing.assert_allclose(np.asarray(outp), np.asarray(outp_ref),
                               rtol=2e-3, atol=2e-3)
    np.testing.assert_allclose(np.asarray(h1), np.asarray(h1_ref),
                               rtol=2e-3, atol=2e-3)
    np.testing.assert_allclose(np.asarray(c1), np.asarray(c1_ref),
                               rtol=2e-3, atol=2e-3)

    assert outp.shape == (batch, num_outputs)
    assert h1.shape == (num_layers, batch, num_outputs)
    assert c1.shape == (num_layers, batch, num_outputs)

    print("KERNEL_OK")
</pallas_src>

<mosaic_0001>
module attributes {stable_mosaic.version = 11 : i64} {
  func.func @fused_lstm_kernel(%arg0: memref<2x32xf32, #tpu.memory_space<vmem>>, %arg1: memref<2x128xf32, #tpu.memory_space<vmem>>, %arg2: memref<2x64x128xf32, #tpu.memory_space<vmem>>, %arg3: memref<2x1x128xf32, #tpu.memory_space<vmem>>, %arg4: memref<2x128xf32, #tpu.memory_space<vmem>>) attributes {dimension_semantics = [], scalar_prefetch = 0 : i64, scratch_operands = 0 : i64, tpu.core_type = #tpu.core_type<tc>} {
    %c0 = arith.constant 0 : index
    %c0_0 = arith.constant 0 : index
    %0 = vector.load %arg0[%c0, %c0_0] : memref<2x32xf32, #tpu.memory_space<vmem>>, vector<2x32xf32>
    %c0_1 = arith.constant 0 : index
    %c0_2 = arith.constant 0 : index
    %1 = vector.load %arg1[%c0_1, %c0_2] : memref<2x128xf32, #tpu.memory_space<vmem>>, vector<2x32xf32>
    %c0_3 = arith.constant 0 : index
    %c32 = arith.constant 32 : index
    %2 = vector.load %arg1[%c0_3, %c32] : memref<2x128xf32, #tpu.memory_space<vmem>>, vector<2x32xf32>
    %3 = tpu.concatenate %0, %1 in 1 : vector<2x32xf32>, vector<2x32xf32> -> vector<2x64xf32>
    %c0_4 = arith.constant 0 : index
    %c0_5 = arith.constant 0 : index
    %c0_6 = arith.constant 0 : index
    %4 = vector.load %arg2[%c0_4, %c0_5, %c0_6] : memref<2x64x128xf32, #tpu.memory_space<vmem>>, vector<1x64x128xf32>
    %5 = vector.shape_cast %4 : vector<1x64x128xf32> to vector<64x128xf32>
    %cst = arith.constant dense<0.000000e+00> : vector<2x128xf32>
    %6 = tpu.matmul %3, %5, %cst {dimension_numbers = #tpu.dot_dimension_numbers<[1], [0], [0], [1], [0, 0, 1, 1], [], []>} : vector<2x64xf32>, vector<64x128xf32>, vector<2x128xf32> -> vector<2x128xf32>
    %c0_7 = arith.constant 0 : index
    %c0_8 = arith.constant 0 : index
    %c0_9 = arith.constant 0 : index
    %7 = vector.load %arg3[%c0_7, %c0_8, %c0_9] : memref<2x1x128xf32, #tpu.memory_space<vmem>>, vector<1x1x128xf32>
    %8 = vector.shape_cast %7 : vector<1x1x128xf32> to vector<1x128xf32>
    %9 = vector.broadcast %8 : vector<1x128xf32> to vector<2x128xf32>
    %10 = arith.addf %6, %9 : vector<2x128xf32>
    %11 = arith.negf %10 : vector<2x128xf32>
    %12 = math.exp %11 : vector<2x128xf32>
    %cst_10 = arith.constant 1.000000e+00 : f32
    %13 = vector.broadcast %cst_10 : f32 to vector<2x128xf32>
    %14 = arith.addf %13, %12 : vector<2x128xf32>
    %15 = arith.divf %13, %14 : vector<2x128xf32>
    %16 = math.tanh %10 : vector<2x128xf32>
    %17 = vector.extract_strided_slice %15 {offsets = [0, 0], sizes = [2, 32], strides = [1, 1]} : vector<2x128xf32> to vector<2x32xf32>
    %18 = vector.extract_strided_slice %15 {offsets = [0, 32], sizes = [2, 32], strides = [1, 1]} : vector<2x128xf32> to vector<2x32xf32>
    %19 = vector.extract_strided_slice %16 {offsets = [0, 64], sizes = [2, 32], strides = [1, 1]} : vector<2x128xf32> to vector<2x32xf32>
    %20 = vector.extract_strided_slice %15 {offsets = [0, 96], sizes = [2, 32], strides = [1, 1]} : vector<2x128xf32> to vector<2x32xf32>
    %21 = arith.mulf %18, %2 : vector<2x32xf32>
    %22 = arith.mulf %17, %19 : vector<2x32xf32>
    %23 = arith.addf %21, %22 : vector<2x32xf32>
    %24 = math.tanh %23 : vector<2x32xf32>
    %25 = arith.mulf %20, %24 : vector<2x32xf32>
    %c0_11 = arith.constant 0 : index
    %c64 = arith.constant 64 : index
    %26 = vector.load %arg1[%c0_11, %c64] : memref<2x128xf32, #tpu.memory_space<vmem>>, vector<2x32xf32>
    %c0_12 = arith.constant 0 : index
    %c96 = arith.constant 96 : index
    %27 = vector.load %arg1[%c0_12, %c96] : memref<2x128xf32, #tpu.memory_space<vmem>>, vector<2x32xf32>
    %28 = tpu.concatenate %25, %26 in 1 : vector<2x32xf32>, vector<2x32xf32> -> vector<2x64xf32>
    %c1 = arith.constant 1 : index
    %c0_13 = arith.constant 0 : index
    %c0_14 = arith.constant 0 : index
    %29 = vector.load %arg2[%c1, %c0_13, %c0_14] : memref<2x64x128xf32, #tpu.memory_space<vmem>>, vector<1x64x128xf32>
    %30 = vector.shape_cast %29 : vector<1x64x128xf32> to vector<64x128xf32>
    %cst_15 = arith.constant dense<0.000000e+00> : vector<2x128xf32>
    %31 = tpu.matmul %28, %30, %cst_15 {dimension_numbers = #tpu.dot_dimension_numbers<[1], [0], [0], [1], [0, 0, 1, 1], [], []>} : vector<2x64xf32>, vector<64x128xf32>, vector<2x128xf32> -> vector<2x128xf32>
    %c1_16 = arith.constant 1 : index
    %c0_17 = arith.constant 0 : index
    %c0_18 = arith.constant 0 : index
    %32 = vector.load %arg3[%c1_16, %c0_17, %c0_18] : memref<2x1x128xf32, #tpu.memory_space<vmem>>, vector<1x1x128xf32>
    %33 = vector.shape_cast %32 : vector<1x1x128xf32> to vector<1x128xf32>
    %34 = vector.broadcast %33 : vector<1x128xf32> to vector<2x128xf32>
    %35 = arith.addf %31, %34 : vector<2x128xf32>
    %36 = arith.negf %35 : vector<2x128xf32>
    %37 = math.exp %36 : vector<2x128xf32>
    %cst_19 = arith.constant 1.000000e+00 : f32
    %38 = vector.broadcast %cst_19 : f32 to vector<2x128xf32>
    %39 = arith.addf %38, %37 : vector<2x128xf32>
    %40 = arith.divf %38, %39 : vector<2x128xf32>
    %41 = math.tanh %35 : vector<2x128xf32>
    %42 = vector.extract_strided_slice %40 {offsets = [0, 0], sizes = [2, 32], strides = [1, 1]} : vector<2x128xf32> to vector<2x32xf32>
    %43 = vector.extract_strided_slice %40 {offsets = [0, 32], sizes = [2, 32], strides = [1, 1]} : vector<2x128xf32> to vector<2x32xf32>
    %44 = vector.extract_strided_slice %41 {offsets = [0, 64], sizes = [2, 32], strides = [1, 1]} : vector<2x128xf32> to vector<2x32xf32>
    %45 = vector.extract_strided_slice %40 {offsets = [0, 96], sizes = [2, 32], strides = [1, 1]} : vector<2x128xf32> to vector<2x32xf32>
    %46 = arith.mulf %43, %27 : vector<2x32xf32>
    %47 = arith.mulf %42, %44 : vector<2x32xf32>
    %48 = arith.addf %46, %47 : vector<2x32xf32>
    %49 = math.tanh %48 : vector<2x32xf32>
    %50 = arith.mulf %45, %49 : vector<2x32xf32>
    %51 = tpu.concatenate %25, %23, %50, %48 in 1 : vector<2x32xf32>, vector<2x32xf32>, vector<2x32xf32>, vector<2x32xf32> -> vector<2x128xf32>
    %c0_20 = arith.constant 0 : index
    %c0_21 = arith.constant 0 : index
    %52 = vector.load %arg4[%c0_20, %c0_21] : memref<2x128xf32, #tpu.memory_space<vmem>>, vector<2x128xf32>
    tpu.vector_store %arg4[%c0_20, %c0_21], %51 {strides = array<i32>} : memref<2x128xf32, #tpu.memory_space<vmem>>, vector<2x128xf32>,
    return
  }
}

</mosaic_0001>

<bundles_post_ra>
// kernel: lstm_controller_forward.1
= control target key start
LH: loop header
LB: loop body
LE: loop exit
PB: predicated region body
PF: predicated region fallthrough
CT: control target
= control target key end

     0   :  { %9 = vsyncpa [#allocation3], 0  ;;  %s272_s18 = smov [#allocation2]   ;;  %s273_s20 = smov 128   ;;  %s349_s0 = inlined_call_operand.vmem [shape: f32[2,32], index: 0, kind: input, shape index: {}]   ;;  %s350_s1 = inlined_call_operand.vmem [shape: f32[2,128], index: 1, kind: input, shape index: {}, may-alias: {1,4}]   ;;  %s351_s2 = inlined_call_operand.hbm [shape: f32[2,64,128], index: 2, kind: input, shape index: {}]   ;;  %s352_s3 = inlined_call_operand.vmem [shape: f32[2,1,128], index: 3, kind: input, shape index: {}]   ;;  %s353_s4 = inlined_call_operand.vmem [shape: f32[2,128], index: 4, kind: output, shape index: {}, may-alias: {1,4}]  }
   0x1   :  { %s18_s17 = sshll.u32 %s351_s2, 4  ;;  %s20_s19 = sshll.u32 %s272_s18, 4  ;;  %s19_s17 = int_to_ptr.hbm [resolvable:$true] %s18_s17  ;;  %s21_s19 = int_to_ptr.vmem [resolvable:$true] %s20_s19 }
   0x2   :  { %s274_s21 = smov 8  }
   0x3   :  { %26 = dma.hbm_to_vmem [thread:$0]  %s19_s17, 2048, %s21_s19, [#allocation3], %s273_s20, %s273_s20, %s274_s21  }
   0x4   :  { %270 = dma.done.wait [#allocation3], 2048  }
   0x5   :  { %271 = vsyncadd [#allocation3], 4294965248  ;;  %v309_v0 = vld [vmem:[%s350_s1] sm:$0x3]  ;;  %v48_v1 = vld [vmem:[#allocation2 + $0x38] sm:$0xff]  ;;  %s275_s24 = smov 32  }
   0x6   :  { %v47_v2 = vld [vmem:[#allocation2 + $0x30] sm:$0xff]  ;;  %36 = vrot.lane.b32.xlu0 %v309_v0, %s275_s24  ;;  %65 = vmatpush.msra.mxu0 %v48_v1  ;;  %v46_v3 = vld [vmem:[#allocation2 + $0x28] sm:$0xff]  ;;  %v45_v4 = vld [vmem:[#allocation2 + $0x20] sm:$0xff]  ;;  %vm39_vm0 = vcmask 261120   ;;  %vm53_vm1 = vcmask 523264   ;;  %s276_s27 = smov 64  }
   0x7   :  { %v44_v5 = vld [vmem:[#allocation2 + $0x18] sm:$0xff]  ;;  %v43_v6 = vld [vmem:[#allocation2 + $0x10] sm:$0xff]  ;;  %v42_v7 = vld [vmem:[#allocation2 + $0x8] sm:$0xff]  ;;  %vm209_vm10 = vcmask 785408  }
   0x8   :  { %66 = vmatpush.msra.mxu0 %v47_v2  ;;  %v41_v8 = vld [vmem:[#allocation2] sm:$0xff]  ;;  %v130_v35 = vld [vmem:[#allocation2 + $0x78] sm:$0xff]  ;;  %v129_v36 = vld [vmem:[#allocation2 + $0x70] sm:$0xff] }
   0x9   :  { %v33_v9 = vld [vmem:[%s349_s0] sm:$0x3]  ;;  %147 = vmatpush.msra.mxu1 %v130_v35  ;;  %v128_v37 = vld [vmem:[#allocation2 + $0x68] sm:$0xff]  ;;  %s277_s0 = smov 96   ;;  %v126_v41 = vld [vmem:[#allocation2 + $0x58] sm:$0xff] }
   0xa   :  { %67 = vmatpush.msra.mxu0 %v46_v3  ;;  %v228_v12 = vld [vmem:[%s352_s3] ss:$0 sm:$0xff]  ;;  %v125_v42 = vld [vmem:[#allocation2 + $0x50] sm:$0xff]  ;;  %v124_v43 = vld [vmem:[#allocation2 + $0x48] sm:$0xff] }
   0xb   :  { %148 = vmatpush.msra.mxu1 %v129_v36  ;;  %v127_v40 = vld [vmem:[#allocation2 + $0x60] sm:$0xff] }
   0xc   :  { %68 = vmatpush.msra.mxu0 %v45_v4  ;;  %v123_v44 = vld [vmem:[#allocation2 + $0x40] sm:$0xff] }
   0xd   :  { %149 = vmatpush.msra.mxu1 %v128_v37  ;;  %v229_v48 = vld [vmem:[%s352_s3 + $0x1] ss:$0 sm:$0xff] }
   0xe   :  { %69 = vmatpush.msra.mxu0 %v44_v5 }
   0xf   :  { %150 = vmatpush.msra.mxu1 %v127_v40 }
  0x10   :  { %70 = vmatpush.msra.mxu0 %v43_v6 }
  0x11   :  { %151 = vmatpush.msra.mxu1 %v126_v41 }
  0x12   :  { %71 = vmatpush.msra.mxu0 %v42_v7 }
  0x13   :  { %152 = vmatpush.msra.mxu1 %v125_v42 }
  0x14   :  { %72 = vmatpush.msra.mxu0 %v41_v8 }
  0x15   :  { %153 = vmatpush.msra.mxu1 %v124_v43 }
  0x17   :  { %154 = vmatpush.msra.mxu1 %v123_v44 }
  0x78   :  { %v37_v10 = vpop.permute.xlu0 %36 }
  0x79   :  { %v40_v11 = vsel %vm39_vm0, %v33_v9, %v37_v10 }
  0x7a   :  { %217 = vmatmul.msk.f32.vlgmr.msra.gmra.mxu0 %vm53_vm1, %v40_v11 }
  0xf7   :  { %v74_v13 = vpop.f32.mrf.mxu0 }
  0xf8   :  { %v75_v14 = vadd.f32 %v228_v12, %v74_v13 }
  0xfa   :  { %230 = vtanh.f32 %v75_v14  ;;  %v218_v16 = vmul.f32 -1.442695, %v75_v14 }
  0xfc   :  { %232 = vpow2.f32 %v218_v16 }
 0x100   :  { %v231_v15 = vpop.eup %230 }
 0x101   :  { %99 = vrot.lane.b32.xlu0 %v231_v15, %s276_s27 }
 0x102   :  { %v233_v17 = vpop.eup %232 }
 0x103   :  { %v80_v18 = vadd.f32 1.0, %v233_v17 }
 0x105   :  { %234 = vrcp.f32 %v80_v18  ;;  %v92_v24 = vand.u32 2147483648, %v80_v18  ;;  %vm86_vm3 = vweird.f32 %v80_v18  ;;  %v90_v25 = vand.u32 2147483647, %v80_v18 }
 0x107   :  { %v93_v27 = vor.u32 1.1754944e-38, %v92_v24  ;;  %vm91_vm5 = vcmp.eq.f32.partialorder %v90_v25, 8.507059e+37 }
 0x10b   :  { %v235_v19 = vpop.eup %234 }
 0x10c   :  { %v82_v20 = vmul.f32 %v235_v19, %v80_v18  ;;  %vm87_vm2 = vweird.f32 %v235_v19 }
 0x10d   :  { %vm88_vm4 = vmor %vm86_vm3, %vm87_vm2 }
 0x10e   :  { %v83_v21 = vsub.f32 1.0, %v82_v20 }
 0x110   :  { %v84_v22 = vmul.f32 %v235_v19, %v83_v21 }
 0x112   :  { %v85_v23 = vadd.f32 %v235_v19, %v84_v22 }
 0x114   :  { %v89_v26 = vsel %vm88_vm4, %v235_v19, %v85_v23 }
 0x115   :  { %v94_v29 = vsel %vm91_vm5, %v93_v27, %v89_v26 }
 0x116   :  { %v97_v31 = vmul.f32 %v94_v29, %v309_v0 }
 0x173   :  { %v100_v28 = vpop.permute.xlu0 %99 }
 0x174   :  { %v102_v30 = vmul.f32 %v100_v28, %v94_v29 }
 0x176   :  { %104 = vrot.lane.b32.xlu1 %v102_v30, %s275_s24 }
 0x1e8   :  { %v105_v32 = vpop.permute.xlu1 %104 }
 0x1e9   :  { %v324_v33 = vadd.f32 %v105_v32, %v97_v31 }
 0x1eb   :  { %236 = vtanh.f32 %v324_v33 }
 0x1f1   :  { %v237_v34 = vpop.eup %236 }
 0x1f2   :  { %110 = vrot.lane.b32.xlu1 %v237_v34, %s276_s27 }
 0x1fa   :  { %179 = vrot.lane.b32.xlu1 %v309_v0, %s276_s27 }
 0x264   :  { %v111_v38 = vpop.permute.xlu1 %110 }
 0x265   :  { %v113_v39 = vmul.f32 %v111_v38, %v94_v29 }
 0x267   :  { %115 = vrot.lane.b32.xlu2 %v113_v39, %s275_s24 }
 0x26c   :  { %v180_v3 = vpop.permute.xlu1 %179 }
 0x26f   :  { %118 = vrot.lane.b32.xlu2 %v309_v0, %s277_s0 }
 0x2c1   :  { %v116_v45 = vpop.permute.xlu2 %115 }
 0x2c2   :  { %v207_v10 = vsel %vm39_vm0, %v116_v45, %v324_v33 }
 0x2c9   :  { %v119_v46 = vpop.permute.xlu2 %118 }
 0x2ca   :  { %v121_v47 = vsel %vm39_vm0, %v116_v45, %v119_v46 }
 0x2cb   :  { %220 = vmatmul.msk.f32.vlgmr.msra.gmra.mxu1 %vm53_vm1, %v121_v47 }
 0x348   :  { %v156_v49 = vpop.f32.mrf.mxu1 }
 0x349   :  { %v157_v50 = vadd.f32 %v229_v48, %v156_v49 }
 0x34b   :  { %238 = vtanh.f32 %v157_v50  ;;  %v221_v52 = vmul.f32 -1.442695, %v157_v50 }
 0x34d   :  { %240 = vpow2.f32 %v221_v52 }
 0x351   :  { %v239_v51 = vpop.eup %238 }
 0x352   :  { %184 = vrot.lane.b32.xlu0 %v239_v51, %s276_s27 }
 0x353   :  { %v241_v53 = vpop.eup %240 }
 0x354   :  { %v162_v54 = vadd.f32 1.0, %v241_v53 }
 0x356   :  { %242 = vrcp.f32 %v162_v54  ;;  %v174_v60 = vand.u32 2147483648, %v162_v54  ;;  %vm168_vm7 = vweird.f32 %v162_v54  ;;  %v172_v61 = vand.u32 2147483647, %v162_v54 }
 0x358   :  { %v175_v63 = vor.u32 1.1754944e-38, %v174_v60  ;;  %vm173_vm9 = vcmp.eq.f32.partialorder %v172_v61, 8.507059e+37 }
 0x35c   :  { %v243_v55 = vpop.eup %242 }
 0x35d   :  { %v164_v56 = vmul.f32 %v243_v55, %v162_v54  ;;  %vm169_vm6 = vweird.f32 %v243_v55 }
 0x35e   :  { %vm170_vm8 = vmor %vm168_vm7, %vm169_vm6 }
 0x35f   :  { %v165_v57 = vsub.f32 1.0, %v164_v56 }
 0x361   :  { %v166_v58 = vmul.f32 %v243_v55, %v165_v57 }
 0x363   :  { %v167_v59 = vadd.f32 %v243_v55, %v166_v58 }
 0x365   :  { %v171_v62 = vsel %vm170_vm8, %v243_v55, %v167_v59 }
 0x366   :  { %v176_v0 = vsel %vm173_vm9, %v175_v63, %v171_v62 }
 0x367   :  { %v182_v4 = vmul.f32 %v180_v3, %v176_v0 }
 0x3c4   :  { %v185_v1 = vpop.permute.xlu0 %184 }
 0x3c5   :  { %v187_v2 = vmul.f32 %v185_v1, %v176_v0 }
 0x3c7   :  { %189 = vrot.lane.b32.xlu2 %v187_v2, %s275_s24 }
 0x421   :  { %v190_v5 = vpop.permute.xlu2 %189 }
 0x422   :  { %v192_v6 = vadd.f32 %v190_v5, %v182_v4 }
 0x424   :  { %244 = vtanh.f32 %v192_v6  ;;  %204 = vrot.lane.b32.xlu2 %v192_v6, %s276_s27 }
 0x42a   :  { %v245_v7 = vpop.eup %244 }
 0x42b   :  { %195 = vrot.lane.b32.xlu0 %v245_v7, %s276_s27 }
 0x47e   :  { %v205_v12 = vpop.permute.xlu2 %204 }
 0x49d   :  { %v196_v8 = vpop.permute.xlu0 %195 }
 0x49e   :  { %v198_v9 = vmul.f32 %v196_v8, %v176_v0 }
 0x4a0   :  { %200 = vrot.lane.b32.xlu1 %v198_v9, %s277_s0 }
 0x512   :  { %v201_v11 = vpop.permute.xlu1 %200 }
 0x513   :  { %v208_v13 = vsel %vm53_vm1, %v207_v10, %v201_v11 }
 0x514   :  { %v210_v14 = vsel %vm209_vm10, %v208_v13, %v205_v12 }
 0x515   :  { %211 = vst [vmem:[%s353_s4] sm:$0x3] %v210_v14 }
 0x516   :  { %216 = vsyncpa [#allocation3], 1 }

</bundles_post_ra>
